<compile_context>
chip_gen: v6e
topology: v6e:2x2x1
jax: 0.10.0
libtpu: 0.0.40
codegen_flags: <defaults>
</compile_context>

<pallas_src>
import jax
import jax.numpy as jnp
from jax.experimental import pallas as pl
from jax.experimental.pallas import tpu as pltpu


# ----------------------------- fused kernel -----------------------------
def _conv_onet_fused_kernel(xT_ref, pT_ref,
                            ew1T_ref, ew2T_ref, eb2T_ref,
                            dwpT_ref, dwcT_ref, dbhT_ref, dwo_ref, dbo_ref,
                            o_ref,
                            cond_ref):
    """grid = (B, T_tiles). Encoder once per batch (t == 0), latent kept in
    VMEM as the (H, 1) decoder conditioning column; each grid step decodes one
    lane-dense query tile."""
    t = pl.program_id(1)

    # -------- encoder: shared per-point MLP + max-pool (once per batch) --------
    @pl.when(t == 0)
    def _encode():
        # xT: (7, N) bf16, channels-major rows [x y z  r g b  1]; the ones row
        # folds enc_b1 into the single K=7 layer-1 matmul.
        xT = xT_ref[0]
        hT = jnp.maximum(
            jnp.dot(ew1T_ref[...], xT, preferred_element_type=jnp.float32), 0.0)   # (H, N) f32
        fT = jnp.dot(ew2T_ref[...], hT.astype(jnp.bfloat16),
                     preferred_element_type=jnp.float32)                           # (C, N) f32
        # enc_b2 added AFTER the max-pool: identical result, (C,1) add not (C,N).
        cT = jnp.max(fT, axis=1, keepdims=True) + eb2T_ref[...]                    # (C, 1)
        # Decoder conditioning hoisted to a per-batch (H,1) column in scratch.
        cond_ref[...] = (jnp.dot(dwcT_ref[...], cT.astype(jnp.bfloat16),
                                 preferred_element_type=jnp.float32)
                         + dbhT_ref[...])                                          # (H, 1)

    # -------- decoder: transposed orientation (no XLU transpose needed) --------
    # hqT (H, T_tile) = relu( WpT (H,3) @ pT (3,T_tile) + cond (H,1) )
    hqT = jnp.maximum(
        jnp.dot(dwpT_ref[...], pT_ref[0], preferred_element_type=jnp.float32)
        + cond_ref[...], 0.0)
    # Lane-dense logits row straight off the MXU: (1,H) @ (H,T_tile) -> (1,T_tile).
    logits = jnp.dot(dwo_ref[...], hqT.astype(jnp.bfloat16),
                     preferred_element_type=jnp.float32)
    o_ref[0] = logits + dbo_ref[0]          # scalar output bias lives in SMEM


# --------------------------- parameter preparation ---------------------------
def _prepare_kernel_params(params):
    """Logical (f32, standard-orientation) params -> kernel-form (bf16, transposed)."""
    bf = jnp.bfloat16
    return {
        # layer-1 weight transposed, bias folded in as an extra column (ones row of xT)
        "ew1T": jnp.concatenate([params["enc_w1"].T,
                                 params["enc_b1"][:, None]], axis=1).astype(bf),  # (H, 7)
        "ew2T": params["enc_w2"].T.astype(bf),                                    # (C, H)
        "eb2T": params["enc_b2"][:, None].astype(jnp.float32),                    # (C, 1)
        "dwpT": params["dec_wp"].T.astype(bf),                                    # (H, 3)
        "dwcT": params["dec_wc"].T.astype(bf),                                    # (H, C)
        "dbhT": params["dec_bh"][:, None].astype(jnp.float32),                    # (H, 1)
        "dwo":  params["dec_wo"][None, :].astype(bf),                             # (1, H)
        "dbo":  params["dec_bo"].astype(jnp.float32),                             # (1,)  -> SMEM
    }


# ------------------------------- fused wrapper -------------------------------
def conv_onet_fused(p, inputs, inputs_colors, params, *, t_tile=128):
    """p: (B, T, 3), inputs/inputs_colors: (B, N, 3) -> logits: (B, T) f32.

    On v6e/v7x a larger t_tile (256+) further improves MXU utilisation for
    large T; 128 keeps v5e's 128-wide MXU fully matched at these sizes.
    """
    B, T, D = p.shape
    _, N, _ = inputs.shape
    assert D == 3 and inputs_colors.shape == inputs.shape
    assert T % t_tile == 0, "query count must be a multiple of the T tile"

    kp = _prepare_kernel_params(params)
    H = kp["dwcT"].shape[0]
    C = kp["ew2T"].shape[0]

    # Layout plumbing (wrapper side): channels-major bf16 operands; ones row
    # appended so the encoder first layer is one K=7 matmul with folded bias.
    xT = jnp.concatenate([inputs, inputs_colors,
                          jnp.ones((B, N, 1), inputs.dtype)], axis=-1)   # (B, N, 7)
    xT = jnp.transpose(xT, (0, 2, 1)).astype(jnp.bfloat16)               # (B, 7, N)
    pT = jnp.transpose(p, (0, 2, 1)).astype(jnp.bfloat16)                # (B, 3, T)

    out = pl.pallas_call(
        _conv_onet_fused_kernel,
        out_shape=jax.ShapeDtypeStruct((B, 1, T), jnp.float32),
        grid_spec=pltpu.PrefetchScalarGridSpec(
            num_scalar_prefetch=0,
            grid=(B, T // t_tile),
            in_specs=[
                # point-cloud block index constant in t -> DMA'd once per batch
                pl.BlockSpec((1, 7, N), lambda b, t: (b, 0, 0)),         # xT
                pl.BlockSpec((1, 3, t_tile), lambda b, t: (b, 0, t)),    # query tile
                pl.BlockSpec((H, 7), lambda b, t: (0, 0)),               # enc W1^T (+b1 col)
                pl.BlockSpec((C, H), lambda b, t: (0, 0)),               # enc W2^T
                pl.BlockSpec((C, 1), lambda b, t: (0, 0)),               # enc b2 (post-max)
                pl.BlockSpec((H, 3), lambda b, t: (0, 0)),               # dec Wp^T
                pl.BlockSpec((H, C), lambda b, t: (0, 0)),               # dec Wc^T
                pl.BlockSpec((H, 1), lambda b, t: (0, 0)),               # dec bh
                pl.BlockSpec((1, H), lambda b, t: (0, 0)),               # dec wo row
                pl.BlockSpec(memory_space=pltpu.MemorySpace.SMEM),       # dec bo scalar
            ],
            out_specs=pl.BlockSpec((1, 1, t_tile), lambda b, t: (b, 0, t)),
            scratch_shapes=[pltpu.VMEM((H, 1), jnp.float32)],            # cond column
        ),
        compiler_params=pltpu.CompilerParams(
            dimension_semantics=("parallel", "arbitrary"),   # B across cores, T stateful
            vmem_limit_bytes=32 * 1024 * 1024,               # safe on v7x's 64 MiB VMEM
        ),
    )(xT, pT, kp["ew1T"], kp["ew2T"], kp["eb2T"],
      kp["dwpT"], kp["dwcT"], kp["dbhT"], kp["dwo"], kp["dbo"])
    return out[:, 0, :]                                      # (B, T), free reshape


# ------------------------- full module forward pass -------------------------
def conv_onet_forward(p, inputs, inputs_colors, params):
    """Mirrors ConvolutionalOccupancyNetwork.forward.

    Returns the Bernoulli distribution over occupancy as (logits, probs),
    both (B, T).  The PyTorch forward recomputes encoder+decoder a second
    time and discards the result; that pass is side-effect-free dead code and
    is not re-executed here.
    """
    logits = conv_onet_fused(p, inputs, inputs_colors, params)
    probs = jax.nn.sigmoid(logits)   # dist.Bernoulli(logits=logits)
    return logits, probs


# ----------------------------- references -----------------------------
def _reference_f32(p, inputs, inputs_colors, params):
    """Exact f32 formula (standard orientation)."""
    x = jnp.concatenate([inputs, inputs_colors], axis=-1)                      # (B, N, 6)
    h = jnp.maximum(jnp.einsum("bnk,kh->bnh", x, params["enc_w1"])
                    + params["enc_b1"], 0.0)
    f = jnp.einsum("bnh,hc->bnc", h, params["enc_w2"])
    c = jnp.max(f, axis=1) + params["enc_b2"]                                  # (B, C)
    cond = jnp.einsum("bc,ch->bh", c, params["dec_wc"]) + params["dec_bh"]     # (B, H)
    hq = jnp.maximum(jnp.einsum("btd,dh->bth", p, params["dec_wp"])
                     + cond[:, None, :], 0.0)
    logits = jnp.einsum("bth,h->bt", hq, params["dec_wo"]) + params["dec_bo"]
    return logits


def _reference_bf16(p, inputs, inputs_colors, kp):
    """JAX reference that applies the SAME bf16 operand casts as the kernel."""
    bf = jnp.bfloat16
    xT = jnp.concatenate([inputs, inputs_colors,
                          jnp.ones_like(inputs[..., :1])], axis=-1)
    xT = jnp.transpose(xT, (0, 2, 1)).astype(bf)                               # (B, 7, N)
    pT = jnp.transpose(p, (0, 2, 1)).astype(bf)                                # (B, 3, T)
    hT = jnp.maximum(jnp.einsum("hk,bkn->bhn", kp["ew1T"], xT,
                                preferred_element_type=jnp.float32), 0.0)
    fT = jnp.einsum("ch,bhn->bcn", kp["ew2T"], hT.astype(bf),
                    preferred_element_type=jnp.float32)
    cT = jnp.max(fT, axis=2, keepdims=True) + kp["eb2T"]                       # (B, C, 1)
    cond = jnp.einsum("hc,bco->bho", kp["dwcT"], cT.astype(bf),
                      preferred_element_type=jnp.float32) + kp["dbhT"]         # (B, H, 1)
    hqT = jnp.maximum(jnp.einsum("hd,bdt->bht", kp["dwpT"], pT,
                                 preferred_element_type=jnp.float32) + cond, 0.0)
    logits = jnp.einsum("oh,bht->bot", kp["dwo"], hqT.astype(bf),
                        preferred_element_type=jnp.float32)[:, 0, :] + kp["dbo"][0]
    return logits


def _init_params(key, hidden=128, cdim=128, pdim=3):
    ks = jax.random.split(key, 9)
    s = lambda k, shape, fan_in: (jax.random.normal(k, shape, jnp.float32)
                                  / jnp.sqrt(fan_in))
    return {
        "enc_w1": s(ks[0], (2 * pdim, hidden), 2 * pdim),    # acts on [xyz, rgb]
        "enc_b1": 0.1 * jax.random.normal(ks[1], (hidden,), jnp.float32),
        "enc_w2": s(ks[2], (hidden, cdim), hidden),
        "enc_b2": 0.1 * jax.random.normal(ks[3], (cdim,), jnp.float32),
        "dec_wp": s(ks[4], (pdim, hidden), pdim),
        "dec_wc": s(ks[5], (cdim, hidden), cdim),
        "dec_bh": 0.1 * jax.random.normal(ks[6], (hidden,), jnp.float32),
        "dec_wo": s(ks[7], (hidden,), hidden),
        "dec_bo": 0.1 * jax.random.normal(ks[8], (1,), jnp.float32),
    }


if __name__ == "__main__":
    B, N, T = 2, 256, 256      # batch, input points, query points
    H, C = 128, 128            # lane-dense hidden width / latent code dim

    key = jax.random.PRNGKey(0)
    k_params, k_p, k_in, k_col = jax.random.split(key, 4)

    params = _init_params(k_params, hidden=H, cdim=C, pdim=3)
    p = jax.random.uniform(k_p, (B, T, 3), jnp.float32, -0.5, 0.5)            # query points
    inputs = jax.random.uniform(k_in, (B, N, 3), jnp.float32, -0.5, 0.5)      # point cloud
    inputs_colors = jax.random.uniform(k_col, (B, N, 3), jnp.float32, 0.0, 1.0)

    logits, probs = jax.jit(conv_onet_forward)(p, inputs, inputs_colors, params)
    logits = jax.block_until_ready(logits)
    probs = jax.block_until_ready(probs)
    assert logits.shape == (B, T) and probs.shape == (B, T)

    # (1) tight check vs a JAX reference applying the SAME bf16 operand casts
    kp = _prepare_kernel_params(params)
    ref_bf16 = _reference_bf16(p, inputs, inputs_colors, kp)
    assert jnp.allclose(logits, ref_bf16, atol=1e-3, rtol=1e-3), "kernel vs bf16 reference"
    assert jnp.allclose(probs, jax.nn.sigmoid(ref_bf16), atol=1e-3, rtol=1e-3)

    # (2) loose sanity check vs the exact f32 formula (bf16 quantization noise only)
    ref_f32 = _reference_f32(p, inputs, inputs_colors, params)
    assert jnp.allclose(logits, ref_f32, atol=1e-1, rtol=1e-1), "kernel vs f32 reference"

    print("KERNEL_OK")
</pallas_src>

<mosaic_0001>
module attributes {stable_mosaic.version = 11 : i64} {
  func.func @_conv_onet_fused_kernel(%arg0: i32, %arg1: i32, %arg2: memref<1x7x256xbf16, #tpu.memory_space<vmem>>, %arg3: memref<1x3x128xbf16, #tpu.memory_space<vmem>>, %arg4: memref<128x7xbf16, #tpu.memory_space<vmem>>, %arg5: memref<128x128xbf16, #tpu.memory_space<vmem>>, %arg6: memref<128x1xf32, #tpu.memory_space<vmem>>, %arg7: memref<128x3xbf16, #tpu.memory_space<vmem>>, %arg8: memref<128x128xbf16, #tpu.memory_space<vmem>>, %arg9: memref<128x1xf32, #tpu.memory_space<vmem>>, %arg10: memref<1x128xbf16, #tpu.memory_space<vmem>>, %arg11: memref<1xf32, #tpu.memory_space<smem>>, %arg12: memref<1x1x128xf32, #tpu.memory_space<vmem>>, %arg13: memref<128x1xf32, #tpu.memory_space<vmem>>) attributes {dimension_semantics = [#tpu.dimension_semantics<parallel>, #tpu.dimension_semantics<arbitrary>], iteration_bounds = array<i64: 2, 2>, scalar_prefetch = 0 : i64, scratch_operands = 1 : i64, tpu.core_type = #tpu.core_type<tc>, window_params = [{transform_indices = @transform_0, window_bounds = array<i64: 1, 7, 256>}, {transform_indices = @transform_1, window_bounds = array<i64: 1, 3, 128>}, {pipeline_mode = #tpu.pipeline_mode<synchronous>, transform_indices = @transform_2, window_bounds = array<i64: 128, 7>}, {pipeline_mode = #tpu.pipeline_mode<synchronous>, transform_indices = @transform_3, window_bounds = array<i64: 128, 128>}, {pipeline_mode = #tpu.pipeline_mode<synchronous>, transform_indices = @transform_4, window_bounds = array<i64: 128, 1>}, {pipeline_mode = #tpu.pipeline_mode<synchronous>, transform_indices = @transform_5, window_bounds = array<i64: 128, 3>}, {pipeline_mode = #tpu.pipeline_mode<synchronous>, transform_indices = @transform_6, window_bounds = array<i64: 128, 128>}, {pipeline_mode = #tpu.pipeline_mode<synchronous>, transform_indices = @transform_7, window_bounds = array<i64: 128, 1>}, {pipeline_mode = #tpu.pipeline_mode<synchronous>, transform_indices = @transform_8, window_bounds = array<i64: 1, 128>}, {transform_indices = @transform_9, window_bounds = array<i64: 1>}, {transform_indices = @transform_10, window_bounds = array<i64: 1, 1, 128>}]} {
    %c0_i32 = arith.constant 0 : i32
    %0 = arith.cmpi eq, %arg1, %c0_i32 : i32
    %1 = arith.extui %0 : i1 to i32
    %c0_i32_0 = arith.constant 0 : i32
    %2 = arith.cmpi ne, %1, %c0_i32_0 : i32
    scf.if %2 {
      %c0_15 = arith.constant 0 : index
      %c0_16 = arith.constant 0 : index
      %c0_17 = arith.constant 0 : index
      %21 = vector.load %arg2[%c0_15, %c0_16, %c0_17] : memref<1x7x256xbf16, #tpu.memory_space<vmem>>, vector<1x7x256xbf16>
      %22 = vector.shape_cast %21 : vector<1x7x256xbf16> to vector<7x256xbf16>
      %c0_18 = arith.constant 0 : index
      %c0_19 = arith.constant 0 : index
      %23 = vector.load %arg4[%c0_18, %c0_19] : memref<128x7xbf16, #tpu.memory_space<vmem>>, vector<128x7xbf16>
      %cst_20 = arith.constant dense<0.000000e+00> : vector<128x256xf32>
      %24 = tpu.matmul %23, %22, %cst_20 {dimension_numbers = #tpu.dot_dimension_numbers<[1], [0], [0], [1], [0, 0, 1, 1], [], []>} : vector<128x7xbf16>, vector<7x256xbf16>, vector<128x256xf32> -> vector<128x256xf32>
      %cst_21 = arith.constant 0.000000e+00 : f32
      %25 = vector.broadcast %cst_21 : f32 to vector<128x256xf32>
      %26 = arith.maximumf %24, %25 : vector<128x256xf32>
      %c0_22 = arith.constant 0 : index
      %c0_23 = arith.constant 0 : index
      %27 = vector.load %arg5[%c0_22, %c0_23] : memref<128x128xbf16, #tpu.memory_space<vmem>>, vector<128x128xbf16>
      %28 = arith.truncf %26 : vector<128x256xf32> to vector<128x256xbf16>
      %cst_24 = arith.constant dense<0.000000e+00> : vector<128x256xf32>
      %29 = tpu.matmul %27, %28, %cst_24 {dimension_numbers = #tpu.dot_dimension_numbers<[1], [0], [0], [1], [0, 0, 1, 1], [], []>} : vector<128x128xbf16>, vector<128x256xbf16>, vector<128x256xf32> -> vector<128x256xf32>
      %cst_25 = arith.constant dense<0xFF800000> : vector<128xf32>
      %30 = vector.multi_reduction <maximumf>, %29, %cst_25 [1] : vector<128x256xf32> to vector<128xf32>
      %31 = vector.shape_cast %30 : vector<128xf32> to vector<128x1xf32>
      %c0_26 = arith.constant 0 : index
      %c0_27 = arith.constant 0 : index
      %32 = vector.load %arg6[%c0_26, %c0_27] : memref<128x1xf32, #tpu.memory_space<vmem>>, vector<128x1xf32>
      %33 = arith.addf %31, %32 : vector<128x1xf32>
      %c0_28 = arith.constant 0 : index
      %c0_29 = arith.constant 0 : index
      %34 = vector.load %arg8[%c0_28, %c0_29] : memref<128x128xbf16, #tpu.memory_space<vmem>>, vector<128x128xbf16>
      %35 = arith.truncf %33 : vector<128x1xf32> to vector<128x1xbf16>
      %cst_30 = arith.constant dense<0.000000e+00> : vector<128x1xf32>
      %36 = tpu.matmul %34, %35, %cst_30 {dimension_numbers = #tpu.dot_dimension_numbers<[1], [0], [0], [1], [0, 0, 1, 1], [], []>} : vector<128x128xbf16>, vector<128x1xbf16>, vector<128x1xf32> -> vector<128x1xf32>
      %c0_31 = arith.constant 0 : index
      %c0_32 = arith.constant 0 : index
      %37 = vector.load %arg9[%c0_31, %c0_32] : memref<128x1xf32, #tpu.memory_space<vmem>>, vector<128x1xf32>
      %38 = arith.addf %36, %37 : vector<128x1xf32>
      %c0_33 = arith.constant 0 : index
      %c0_34 = arith.constant 0 : index
      %39 = vector.load %arg13[%c0_33, %c0_34] : memref<128x1xf32, #tpu.memory_space<vmem>>, vector<128x1xf32>
      tpu.vector_store %arg13[%c0_33, %c0_34], %38 {strides = array<i32>} : memref<128x1xf32, #tpu.memory_space<vmem>>, vector<128x1xf32>,
    } else {
    }
    %c0 = arith.constant 0 : index
    %c0_1 = arith.constant 0 : index
    %3 = vector.load %arg7[%c0, %c0_1] : memref<128x3xbf16, #tpu.memory_space<vmem>>, vector<128x3xbf16>
    %c0_2 = arith.constant 0 : index
    %c0_3 = arith.constant 0 : index
    %c0_4 = arith.constant 0 : index
    %4 = vector.load %arg3[%c0_2, %c0_3, %c0_4] : memref<1x3x128xbf16, #tpu.memory_space<vmem>>, vector<1x3x128xbf16>
    %5 = vector.shape_cast %4 : vector<1x3x128xbf16> to vector<3x128xbf16>
    %cst = arith.constant dense<0.000000e+00> : vector<128x128xf32>
    %6 = tpu.matmul %3, %5, %cst {dimension_numbers = #tpu.dot_dimension_numbers<[1], [0], [0], [1], [0, 0, 1, 1], [], []>} : vector<128x3xbf16>, vector<3x128xbf16>, vector<128x128xf32> -> vector<128x128xf32>
    %c0_5 = arith.constant 0 : index
    %c0_6 = arith.constant 0 : index
    %7 = vector.load %arg13[%c0_5, %c0_6] : memref<128x1xf32, #tpu.memory_space<vmem>>, vector<128x1xf32>
    %8 = vector.broadcast %7 : vector<128x1xf32> to vector<128x128xf32>
    %9 = arith.addf %6, %8 : vector<128x128xf32>
    %cst_7 = arith.constant 0.000000e+00 : f32
    %10 = vector.broadcast %cst_7 : f32 to vector<128x128xf32>
    %11 = arith.maximumf %9, %10 : vector<128x128xf32>
    %c0_8 = arith.constant 0 : index
    %c0_9 = arith.constant 0 : index
    %12 = vector.load %arg10[%c0_8, %c0_9] : memref<1x128xbf16, #tpu.memory_space<vmem>>, vector<1x128xbf16>
    %13 = arith.truncf %11 : vector<128x128xf32> to vector<128x128xbf16>
    %cst_10 = arith.constant dense<0.000000e+00> : vector<1x128xf32>
    %14 = tpu.matmul %12, %13, %cst_10 {dimension_numbers = #tpu.dot_dimension_numbers<[1], [0], [0], [1], [0, 0, 1, 1], [], []>} : vector<1x128xbf16>, vector<128x128xbf16>, vector<1x128xf32> -> vector<1x128xf32>
    %c0_11 = arith.constant 0 : index
    %15 = memref.load %arg11[%c0_11] : memref<1xf32, #tpu.memory_space<smem>>
    %16 = vector.broadcast %15 : f32 to vector<1x128xf32>
    %17 = arith.addf %14, %16 : vector<1x128xf32>
    %c0_12 = arith.constant 0 : index
    %c0_13 = arith.constant 0 : index
    %c0_14 = arith.constant 0 : index
    %18 = vector.load %arg12[%c0_12, %c0_13, %c0_14] : memref<1x1x128xf32, #tpu.memory_space<vmem>>, vector<1x1x128xf32>
    %19 = vector.shape_cast %18 : vector<1x1x128xf32> to vector<1x128xf32>
    %20 = vector.shape_cast %17 : vector<1x128xf32> to vector<1x1x128xf32>
    tpu.vector_store %arg12[%c0_12, %c0_13, %c0_14], %20 {strides = array<i32>} : memref<1x1x128xf32, #tpu.memory_space<vmem>>, vector<1x1x128xf32>,
    return
  }
  func.func @transform_0(%arg0: i32, %arg1: i32) -> (i32, i32, i32) {
    %c0_i32 = arith.constant 0 : i32
    %c0_i32_0 = arith.constant 0 : i32
    %c0_i32_1 = arith.constant 0 : i32
    return %arg0, %c0_i32, %c0_i32_0 : i32, i32, i32
  }
  func.func @transform_1(%arg0: i32, %arg1: i32) -> (i32, i32, i32) {
    %c0_i32 = arith.constant 0 : i32
    %c0_i32_0 = arith.constant 0 : i32
    return %arg0, %c0_i32, %arg1 : i32, i32, i32
  }
  func.func @transform_2(%arg0: i32, %arg1: i32) -> (i32, i32) {
    %c0_i32 = arith.constant 0 : i32
    %c0_i32_0 = arith.constant 0 : i32
    %c0_i32_1 = arith.constant 0 : i32
    return %c0_i32, %c0_i32_0 : i32, i32
  }
  func.func @transform_3(%arg0: i32, %arg1: i32) -> (i32, i32) {
    %c0_i32 = arith.constant 0 : i32
    %c0_i32_0 = arith.constant 0 : i32
    %c0_i32_1 = arith.constant 0 : i32
    return %c0_i32, %c0_i32_0 : i32, i32
  }
  func.func @transform_4(%arg0: i32, %arg1: i32) -> (i32, i32) {
    %c0_i32 = arith.constant 0 : i32
    %c0_i32_0 = arith.constant 0 : i32
    %c0_i32_1 = arith.constant 0 : i32
    return %c0_i32, %c0_i32_0 : i32, i32
  }
  func.func @transform_5(%arg0: i32, %arg1: i32) -> (i32, i32) {
    %c0_i32 = arith.constant 0 : i32
    %c0_i32_0 = arith.constant 0 : i32
    %c0_i32_1 = arith.constant 0 : i32
    return %c0_i32, %c0_i32_0 : i32, i32
  }
  func.func @transform_6(%arg0: i32, %arg1: i32) -> (i32, i32) {
    %c0_i32 = arith.constant 0 : i32
    %c0_i32_0 = arith.constant 0 : i32
    %c0_i32_1 = arith.constant 0 : i32
    return %c0_i32, %c0_i32_0 : i32, i32
  }
  func.func @transform_7(%arg0: i32, %arg1: i32) -> (i32, i32) {
    %c0_i32 = arith.constant 0 : i32
    %c0_i32_0 = arith.constant 0 : i32
    %c0_i32_1 = arith.constant 0 : i32
    return %c0_i32, %c0_i32_0 : i32, i32
  }
  func.func @transform_8(%arg0: i32, %arg1: i32) -> (i32, i32) {
    %c0_i32 = arith.constant 0 : i32
    %c0_i32_0 = arith.constant 0 : i32
    %c0_i32_1 = arith.constant 0 : i32
    return %c0_i32, %c0_i32_0 : i32, i32
  }
  func.func @transform_9(%arg0: i32, %arg1: i32) -> i32 {
    %c0_i32 = arith.constant 0 : i32
    %c0_i32_0 = arith.constant 0 : i32
    return %c0_i32 : i32
  }
  func.func @transform_10(%arg0: i32, %arg1: i32) -> (i32, i32, i32) {
    %c0_i32 = arith.constant 0 : i32
    %c0_i32_0 = arith.constant 0 : i32
    return %arg0, %c0_i32, %arg1 : i32, i32, i32
  }
}

</mosaic_0001>

<bundles_post_ra>
// kernel: conv_onet_forward.1
= control target key start
LH: loop header
LB: loop body
LE: loop exit
PB: predicated region body
PF: predicated region fallthrough
CT: control target
= control target key end

     0   :  { %s1928_s15 = smov 0   ;;  %s1930_s16 = smov 0   ;;  %s2282_s0 = inlined_call_operand.vmem [shape: bf16[2,7,256], index: 0, kind: input, shape index: {}]   ;;  %s2283_s1 = inlined_call_operand.vmem [shape: bf16[2,3,256], index: 1, kind: input, shape index: {}]   ;;  %s2284_s2 = inlined_call_operand.vmem [shape: bf16[128,7], index: 2, kind: input, shape index: {}]   ;;  %s2285_s3 = inlined_call_operand.vmem [shape: bf16[128,128], index: 3, kind: input, shape index: {}]   ;;  %s2286_s4 = inlined_call_operand.vmem [shape: f32[128,1], index: 4, kind: input, shape index: {}]   ;;  %s2287_s5 = inlined_call_operand.vmem [shape: bf16[128,3], index: 5, kind: input, shape index: {}]   ;;  %s2288_s6 = inlined_call_operand.vmem [shape: bf16[128,128], index: 6, kind: input, shape index: {}]   ;;  %s2289_s7 = inlined_call_operand.vmem [shape: f32[128,1], index: 7, kind: input, shape index: {}]   ;;  %s2290_s8 = inlined_call_operand.vmem [shape: bf16[1,128], index: 8, kind: input, shape index: {}]   ;;  %s2291_s9 = inlined_call_operand.<no memory space> [shape: f32[1], index: 9, kind: input, shape index: {}]   ;;  %s2292_s10 = inlined_call_operand.vmem [shape: f32[2,1,256], index: 10, kind: output, shape index: {}]  }
   0x1   :  { %15 = sst [smem:[#allocation3]] %s2291_s9  ;;  %s1932_s17 = smov 0  }
   0x2   :  { %s1934_s18 = smov 0   ;;  %s1936_s19 = smov 0  }
   0x3 LB: > { %s30_s9 = sadd.s32 1, %s1854_s17  ;;  %s33_s20 = sadd.s32 1, %s1858_s18  ;;  %s1862_s19 = sphi %s1936_s19, %s21_s19   ;;  %s1858_s18 = sphi %s1934_s18, %s2296_s18   ;;  %s1854_s17 = sphi %s1932_s17, %s2295_s17   ;;  %s1850_s16 = sphi %s1930_s16, %s2294_s16   ;;  %s1846_s15 = sphi %s1928_s15, %s2293_s15  }
   0x4   : > { %p31_p0 = scmp.ge.s32.totalorder %s30_s9, 2  ;;  %p1578_p1 = scmp.ge.s32.totalorder %s1862_s19, 1 }
   0x5   : > { %p342_p2 = scmp.lt.s32.totalorder %s1862_s19, 5 }
   0x6   : > { %s2298_s9 = smov (%p31_p0, %s30_s9), 0  ;;  %s2300_s20 = smov (!%p31_p0, %s33_s20), %s1858_s18 }
   0x7   : > { %p343_p3 = pnand %p1578_p1, %p342_p2  ;;  %p35_p4 = scmp.ge.s32.totalorder %s2300_s20, 2 }
   0x8   : > { %p390_p5 = scmp.lt.s32.totalorder (!%p343_p3), %s1850_s16, 1  ;;  %p397_p6 = scmp.lt.s32.totalorder (!%p343_p3), %s1846_s15, 1 }
   0x9   : > { %s2302_s20 = smov (%p35_p4, %s2300_s20), 0  ;;  %346 = sbr.rel (%p343_p3) target bundleno = 1447 (0x5a7), region = 60 }
   0xa   : > { %p1584_p7 = scmp.ne.s32.totalorder (!%p343_p3), %s1846_s15, 0 }
   0xe   : > { %s2304_s16 = smov (!%p390_p5, %s1850_s16), 1 }
   0xf   : > { %s398_s21 = scalar_select %p397_p6, %s1846_s15, 1 }
  0x10   : > { %s1637_s22 = sshll.u32 %s2304_s16, 3  ;;  %s1581_s23 = sshll.u32 %s2304_s16, 1 }
  0x11   : > { %s394_s26 = scalar_lea.vmem %s2282_s0, %s1637_s22  ;;  %s1961_s27 = sadd.s32 %s1581_s23, %s398_s21 }
  0x12   : > { %s1582_s28 = sshll.u32 %s1961_s27, 1  ;;  %s409_s11 = scalar_lea.vmem %s2292_s10, %s1961_s27 }
  0x13   : > { %s1971_s14 = scalar_lea.vmem %s2283_s1, %s1582_s28  ;;  %414 = sbr.rel (%p1584_p7) target bundleno = 981 (0x3d5), region = 64 }
  0x18   : > { %v415_v0 = vld [vmem:[%s394_s26] sm:$0xff]  ;;  %vm502_vm0 = vcmask 1042432   ;;  %vm503_vm1 = vcmask 1043456   ;;  %v1864_v2 = vmov 65535   ;;  %v1865_v5 = vmov 0   ;;  %v1791_v10 = vld [vmem:[%s2284_s2 + $0x8] sm:$0xff]  }
  0x19   : > { %v1594_v1 = vcombine.high %v415_v0, %v415_v0  ;;  %v504_v3 = vsel %vm502_vm0, 4294967295, %v1864_v2  ;;  %v1593_v4 = vcombine.low %v415_v0, %v415_v0  ;;  %544 = vmatprep.mubr.bf16.mxu0 %v1865_v5  ;;  %769 = vmatprep.mubr.bf16.mxu1 %v1865_v5  ;;  %v1790_v9 = vld [vmem:[%s2284_s2] sm:$0xff]   ;;  %vm477_vm2 = vcmask 56320   ;;  %v1792_v11 = vld [vmem:[%s2284_s2 + $0x10] sm:$0xff]   ;;  %v1793_v12 = vld [vmem:[%s2284_s2 + $0x18] sm:$0xff]  }
  0x1a   : > { %v505_v6 = vsel %vm503_vm1, %v504_v3, 0  ;;  %v1794_v13 = vld [vmem:[%s2284_s2 + $0x20] sm:$0xff]   ;;  %v1795_v14 = vld [vmem:[%s2284_s2 + $0x28] sm:$0xff]   ;;  %v1796_v15 = vld [vmem:[%s2284_s2 + $0x30] sm:$0xff]   ;;  %vm1115_vm3 = vcmask 7168  }
  0x1b   : > { %v510_v7 = vand.u32 %v1594_v1, %v505_v6  ;;  %v507_v8 = vand.u32 %v1593_v4, %v505_v6  ;;  %v1797_v16 = vld [vmem:[%s2284_s2 + $0x38] sm:$0xff]  }
  0x1d   : > { %526 = vmatprep.subr.bf16.mxu0 %v510_v7 }
  0x1e   : > { %527 = vmatpush1.bf16.msra.mxu0 %v507_v8 }
  0x21   : > { %1595 = vmatmul.mubr.msk.bf16.vlgmr.msra.gmra.mxu0 %vm477_vm2, %v1790_v9 }
  0x22   : > { %554 = vmatprep.mubr.bf16.mxu0 %v1865_v5 }
  0x29   : > { %1596 = vmatmul.mubr.msk.bf16.gmra.mxu0 %vm477_vm2, %v1791_v10 }
  0x2a   : > { %564 = vmatprep.mubr.bf16.mxu0 %v1865_v5 }
  0x31   : > { %1597 = vmatmul.mubr.msk.bf16.gmra.mxu0 %vm477_vm2, %v1792_v11 }
  0x32   : > { %574 = vmatprep.mubr.bf16.mxu0 %v1865_v5 }
  0x39   : > { %1598 = vmatmul.mubr.msk.bf16.gmra.mxu0 %vm477_vm2, %v1793_v12 }
  0x3a   : > { %584 = vmatprep.mubr.bf16.mxu0 %v1865_v5 }
  0x41   : > { %1599 = vmatmul.mubr.msk.bf16.gmra.mxu0 %vm477_vm2, %v1794_v13 }
  0x42   : > { %594 = vmatprep.mubr.bf16.mxu0 %v1865_v5 }
  0x49   : > { %1600 = vmatmul.mubr.msk.bf16.gmra.mxu0 %vm477_vm2, %v1795_v14 }
  0x4a   : > { %604 = vmatprep.mubr.bf16.mxu0 %v1865_v5 }
  0x51   : > { %1601 = vmatmul.mubr.msk.bf16.gmra.mxu0 %vm477_vm2, %v1796_v15 }
  0x52   : > { %614 = vmatprep.mubr.bf16.mxu0 %v1865_v5 }
  0x59   : > { %1602 = vmatmul.mubr.msk.bf16.gmra.mxu0 %vm477_vm2, %v1797_v16 }
  0xe1   : > { %v546_v17 = vpop.f32.mrf.mxu0 }
  0xe2   : > { %v625_v20 = vmax.f32 %v546_v17, 0.0 }
  0xe3   : > { %v548_v18 = vpop.f32.mrf.mxu0 }
  0xe4   : > { %v626_v23 = vmax.f32 %v548_v18, 0.0 }
  0xe5   : > { %v550_v19 = vpop.f32.mrf.mxu0 }
  0xe6   : > { %v627_v21 = vmax.f32 %v550_v19, 0.0 }
  0xe7   : > { %v552_v22 = vpop.f32.mrf.mxu0 }
  0xe8   : > { %v2014_v24 = vpack.c.bf16 %v627_v21, %v625_v20  ;;  %v628_v25 = vmax.f32 %v552_v22, 0.0 }
  0xe9   : > { %v556_v26 = vpop.f32.mrf.mxu0 }
  0xea   : > { %v2016_v27 = vpack.c.bf16 %v628_v25, %v626_v23  ;;  %v629_v30 = vmax.f32 %v556_v26, 0.0 }
  0xeb   : > { %v558_v28 = vpop.f32.mrf.mxu0 }
  0xec   : > { %v630_v33 = vmax.f32 %v558_v28, 0.0 }
  0xed   : > { %v560_v29 = vpop.f32.mrf.mxu0 }
  0xee   : > { %v631_v31 = vmax.f32 %v560_v29, 0.0 }
  0xef   : > { %v562_v32 = vpop.f32.mrf.mxu0 }
  0xf0   : > { %v2018_v34 = vpack.c.bf16 %v631_v31, %v629_v30  ;;  %v632_v35 = vmax.f32 %v562_v32, 0.0 }
  0xf1   : > { %v2020_v36 = vpop.f32.mrf.mxu0 }
  0xf2   : > { %v2022_v37 = vpack.c.bf16 %v632_v35, %v630_v33  ;;  %v633_v35 = vmax.f32 %v2020_v36, 0.0  ;;  %v1799_v36 = vld [vmem:[%s2285_s3 + $0x8] sm:$0xff]  }
  0xf3   : > { %v2024_v38 = vpop.f32.mrf.mxu0 }
  0xf4   : > { %v634_v30 = vmax.f32 %v2024_v38, 0.0  ;;  %v1798_v38 = vld [vmem:[%s2285_s3] sm:$0xff]  }
  0xf5   : > { %v2026_v39 = vpop.f32.mrf.mxu0 }
  0xf6   : > { %v635_v31 = vmax.f32 %v2026_v39, 0.0  ;;  %v1804_v39 = vld [vmem:[%s2285_s3 + $0x30] sm:$0xff]  }
  0xf7   : > { %v2028_v40 = vpop.f32.mrf.mxu0 }
  0xf8   : > { %v636_v26 = vmax.f32 %v2028_v40, 0.0  ;;  %v1805_v40 = vld [vmem:[%s2285_s3 + $0x38] sm:$0xff]  }
  0xf9   : > { %v576_v41 = vpop.f32.mrf.mxu0 }
  0xfa   : > { %v637_v29 = vmax.f32 %v576_v41, 0.0  ;;  %v678_v33 = vpack.c.bf16 %v636_v26, %v634_v30 }
  0xfb   : > { %v578_v42 = vpop.f32.mrf.mxu0 }
  0xfc   : > { %v638_v22 = vmax.f32 %v578_v42, 0.0  ;;  %v677_v42 = vpack.c.bf16 %v635_v31, %v633_v35  ;;  %v912_v35 = vld [vmem:[%s2286_s4 + $0x70] sm:$0xff] }
  0xfd   : > { %v580_v43 = vpop.f32.mrf.mxu0 }
  0xfe   : > { %v639_v23 = vmax.f32 %v580_v43, 0.0 }
  0xff   : > { %v582_v44 = vpop.f32.mrf.mxu0 }
 0x100   : > { %v640_v19 = vmax.f32 %v582_v44, 0.0  ;;  %v679_v32 = vpack.c.bf16 %v639_v23, %v637_v29 }
 0x101   : > { %v586_v45 = vpop.f32.mrf.mxu0 }
 0x102   : > { %v641_v21 = vmax.f32 %v586_v45, 0.0  ;;  %v680_v28 = vpack.c.bf16 %v640_v19, %v638_v22 }
 0x103   : > { %v588_v46 = vpop.f32.mrf.mxu0 }
 0x104   : > { %v642_v16 = vmax.f32 %v588_v46, 0.0 }
 0x105   : > { %v590_v47 = vpop.f32.mrf.mxu0 }
 0x106   : > { %v643_v17 = vmax.f32 %v590_v47, 0.0 }
 0x107   : > { %v592_v48 = vpop.f32.mrf.mxu0 }
 0x108   : > { %v644_v13 = vmax.f32 %v592_v48, 0.0  ;;  %v681_v25 = vpack.c.bf16 %v643_v17, %v641_v21 }
 0x109   : > { %v596_v49 = vpop.f32.mrf.mxu0 }
 0x10a   : > { %v645_v15 = vmax.f32 %v596_v49, 0.0  ;;  %v682_v20 = vpack.c.bf16 %v644_v13, %v642_v16 }
 0x10b   : > { %v598_v50 = vpop.f32.mrf.mxu0 }
 0x10c   : > { %v646_v10 = vmax.f32 %v598_v50, 0.0 }
 0x10d   : > { %v600_v51 = vpop.f32.mrf.mxu0 }
 0x10e   : > { %v647_v11 = vmax.f32 %v600_v51, 0.0 }
 0x10f   : > { %v602_v52 = vpop.f32.mrf.mxu0 }
 0x110   : > { %v648_v7 = vmax.f32 %v602_v52, 0.0  ;;  %v683_v18 = vpack.c.bf16 %v647_v11, %v645_v15 }
 0x111   : > { %v606_v53 = vpop.f32.mrf.mxu0 }
 0x112   : > { %v649_v9 = vmax.f32 %v606_v53, 0.0  ;;  %v684_v14 = vpack.c.bf16 %v648_v7, %v646_v10 }
 0x113   : > { %v608_v54 = vpop.f32.mrf.mxu0 }
 0x114   : > { %v650_v2 = vmax.f32 %v608_v54, 0.0 }
 0x115   : > { %v610_v55 = vpop.f32.mrf.mxu0 }
 0x116   : > { %v651_v4 = vmax.f32 %v610_v55, 0.0 }
 0x117   : > { %v612_v56 = vpop.f32.mrf.mxu0 }
 0x118   : > { %v652_v62 = vmax.f32 %v612_v56, 0.0  ;;  %v685_v12 = vpack.c.bf16 %v651_v4, %v649_v9 }
 0x119   : > { %v616_v57 = vpop.f32.mrf.mxu0 }
 0x11a   : > { %v653_v1 = vmax.f32 %v616_v57, 0.0  ;;  %v686_v8 = vpack.c.bf16 %v652_v62, %v650_v2 }
 0x11b   : > { %v618_v58 = vpop.f32.mrf.mxu0 }
 0x11c   : > { %v654_v63 = vmax.f32 %v618_v58, 0.0 }
 0x11d   : > { %v620_v59 = vpop.f32.mrf.mxu0 }
 0x11e   : > { %v655_v60 = vmax.f32 %v620_v59, 0.0 }
 0x11f   : > { %v622_v61 = vpop.f32.mrf.mxu0 }
 0x120   : > { %v656_v0 = vmax.f32 %v622_v61, 0.0  ;;  %v687_v6 = vpack.c.bf16 %v655_v60, %v653_v1 }
 0x122   : > { %v688_v3 = vpack.c.bf16 %v656_v0, %v654_v63 }
 0x124   : > { %737 = vmatprep.subr.bf16.mxu1 %v688_v3 }
 0x125   : > { %738 = vmatpush1.bf16.msra.mxu1 %v687_v6 }
 0x126   : > { %739 = vmatprep.subr.bf16.mxu1 %v686_v8 }
 0x129   : > { %740 = vmatpush1.bf16.msra.mxu1 %v685_v12 }
 0x12a   : > { %741 = vmatprep.subr.bf16.mxu1 %v684_v14 }
 0x12d   : > { %742 = vmatpush1.bf16.msra.mxu1 %v683_v18 }
 0x12e   : > { %743 = vmatprep.subr.bf16.mxu1 %v682_v20 }
 0x131   : > { %744 = vmatpush1.bf16.msra.mxu1 %v681_v25 }
 0x132   : > { %745 = vmatprep.subr.bf16.mxu1 %v680_v28  ;;  %v1806_v28 = vld [vmem:[%s2288_s6] sm:$0xff]  }
 0x133   : > { %1688 = vmatprep.mubr.bf16.mxu0 %v1806_v28  ;;  %v956_v28 = vld [vmem:[%s2289_s7 + $0x10] sm:$0xff] }
 0x135   : > { %746 = vmatpush1.bf16.msra.mxu1 %v679_v32 }
 0x136   : > { %747 = vmatprep.subr.bf16.mxu1 %v678_v33  ;;  %v911_v33 = vld [vmem:[%s2286_s4 + $0x68] sm:$0xff] }
 0x139   : > { %748 = vmatpush1.bf16.msra.mxu1 %v677_v42  ;;  %v913_v42 = vld [vmem:[%s2286_s4 + $0x78] sm:$0xff] }
 0x13a   : > { %749 = vmatprep.subr.bf16.mxu1 %v2022_v37  ;;  %v1803_v37 = vld [vmem:[%s2285_s3 + $0x28] sm:$0xff]  }
 0x13d   : > { %750 = vmatpush1.bf16.msra.mxu1 %v2018_v34  ;;  %v1802_v34 = vld [vmem:[%s2285_s3 + $0x20] sm:$0xff]  }
 0x13e   : > { %751 = vmatprep.subr.bf16.mxu1 %v2016_v27  ;;  %v1800_v27 = vld [vmem:[%s2285_s3 + $0x10] sm:$0xff]  }
 0x141   : > { %752 = vmatpush1.bf16.msra.mxu1 %v2014_v24  ;;  %v1801_v24 = vld [vmem:[%s2285_s3 + $0x18] sm:$0xff]  }
 0x144   : > { %770 = vmatmul.mubr.bf16.vlgmr.msra.gmra.mxu1 %v1798_v38  ;;  %v910_v38 = vld [vmem:[%s2286_s4 + $0x60] sm:$0xff] }
 0x145   : > { %779 = vmatprep.mubr.bf16.mxu1 %v1865_v5 }
 0x14c   : > { %780 = vmatmul.mubr.bf16.gmra.mxu1 %v1799_v36 }
 0x14d   : > { %789 = vmatprep.mubr.bf16.mxu1 %v1865_v5 }
 0x154   : > { %790 = vmatmul.mubr.bf16.gmra.mxu1 %v1800_v27 }
 0x155   : > { %799 = vmatprep.mubr.bf16.mxu1 %v1865_v5 }
 0x15c   : > { %800 = vmatmul.mubr.bf16.gmra.mxu1 %v1801_v24 }
 0x15d   : > { %809 = vmatprep.mubr.bf16.mxu1 %v1865_v5 }
 0x164   : > { %810 = vmatmul.mubr.bf16.gmra.mxu1 %v1802_v34 }
 0x165   : > { %819 = vmatprep.mubr.bf16.mxu1 %v1865_v5 }
 0x16c   : > { %820 = vmatmul.mubr.bf16.gmra.mxu1 %v1803_v37 }
 0x16d   : > { %829 = vmatprep.mubr.bf16.mxu1 %v1865_v5 }
 0x174   : > { %830 = vmatmul.mubr.bf16.gmra.mxu1 %v1804_v39  ;;  %v908_v39 = vld [vmem:[%s2286_s4 + $0x50] sm:$0xff] }
 0x175   : > { %839 = vmatprep.mubr.bf16.mxu1 %v1865_v5 }
 0x17c   : > { %840 = vmatmul.mubr.bf16.gmra.mxu1 %v1805_v40 }
 0x204   : > { %v2069_v41 = vpop.f32.mrf.mxu1 }
 0x206   : > { %v773_v43 = vpop.f32.mrf.mxu1 }
 0x207   : > { %v850_v44 = vmax.f32 %v2069_v41, %v773_v43  ;;  %v909_v43 = vld [vmem:[%s2286_s4 + $0x58] sm:$0xff] }
 0x208   : > { %v775_v45 = vpop.f32.mrf.mxu1 }
 0x20a   : > { %v777_v46 = vpop.f32.mrf.mxu1 }
 0x20b   : > { %v853_v47 = vmax.f32 %v775_v45, %v777_v46 }
 0x20c   : > { %v781_v48 = vpop.f32.mrf.mxu1 }
 0x20e   : > { %v783_v49 = vpop.f32.mrf.mxu1 }
 0x20f   : > { %v856_v50 = vmax.f32 %v781_v48, %v783_v49  ;;  %v906_v48 = vld [vmem:[%s2286_s4 + $0x40] sm:$0xff] }
 0x210   : > { %v785_v51 = vpop.f32.mrf.mxu1 }
 0x212   : > { %v787_v52 = vpop.f32.mrf.mxu1 }
 0x213   : > { %v859_v23 = vmax.f32 %v785_v51, %v787_v52 }
 0x214   : > { %v791_v53 = vpop.f32.mrf.mxu1 }
 0x216   : > { %v793_v5 = vpop.f32.mrf.mxu1 }
 0x217   : > { %v862_v26 = vmax.f32 %v791_v53, %v793_v5  ;;  %v904_v5 = vld [vmem:[%s2286_s4 + $0x30] sm:$0xff] }
 0x218   : > { %v795_v54 = vpop.f32.mrf.mxu1 }
 0x21a   : > { %v797_v55 = vpop.f32.mrf.mxu1 }
 0x21b   : > { %v865_v21 = vmax.f32 %v795_v54, %v797_v55  ;;  %v905_v55 = vld [vmem:[%s2286_s4 + $0x38] sm:$0xff] }
 0x21c   : > { %v801_v56 = vpop.f32.mrf.mxu1 }
 0x21e   : > { %v803_v57 = vpop.f32.mrf.mxu1 }
 0x21f   : > { %v868_v25 = vmax.f32 %v801_v56, %v803_v57 }
 0x220   : > { %v805_v58 = vpop.f32.mrf.mxu1 }
 0x222   : > { %v807_v59 = vpop.f32.mrf.mxu1 }
 0x223   : > { %v871_v19 = vmax.f32 %v805_v58, %v807_v59 }
 0x224   : > { %v811_v60 = vpop.f32.mrf.mxu1 }
 0x226   : > { %v813_v61 = vpop.f32.mrf.mxu1 }
 0x227   : > { %v874_v22 = vmax.f32 %v811_v60, %v813_v61  ;;  %v902_v60 = vld [vmem:[%s2286_s4 + $0x20] sm:$0xff] }
 0x228   : > { %v815_v62 = vpop.f32.mrf.mxu1 }
 0x22a   : > { %v817_v63 = vpop.f32.mrf.mxu1 }
 0x22b   : > { %v877_v17 = vmax.f32 %v815_v62, %v817_v63  ;;  %v903_v62 = vld [vmem:[%s2286_s4 + $0x28] sm:$0xff] }
 0x22c   : > { %v821_v0 = vpop.f32.mrf.mxu1 }
 0x22e   : > { %v823_v1 = vpop.f32.mrf.mxu1 }
 0x22f   : > { %v880_v20 = vmax.f32 %v821_v0, %v823_v1 }
 0x230   : > { %v825_v2 = vpop.f32.mrf.mxu1 }
 0x232   : > { %v827_v3 = vpop.f32.mrf.mxu1 }
 0x233   : > { %v883_v13 = vmax.f32 %v825_v2, %v827_v3  ;;  %v900_v3 = vld [vmem:[%s2286_s4 + $0x10] sm:$0xff] }
 0x234   : > { %v831_v4 = vpop.f32.mrf.mxu1 }
 0x236   : > { %v833_v6 = vpop.f32.mrf.mxu1 }
 0x237   : > { %v886_v7 = vmax.f32 %v831_v4, %v833_v6  ;;  %v901_v6 = vld [vmem:[%s2286_s4 + $0x18] sm:$0xff] }
 0x238   : > { %v835_v8 = vpop.f32.mrf.mxu1 }
 0x239   : > { %887 = vmax.xlane.f32.xlu1 %v886_v7 }
 0x23a   : > { %v837_v9 = vpop.f32.mrf.mxu1 }
 0x23b   : > { %v889_v10 = vmax.f32 %v835_v8, %v837_v9 }
 0x23c   : > { %v841_v11 = vpop.f32.mrf.mxu1 }
 0x23d   : > { %890 = vmax.xlane.f32.xlu1 %v889_v10  ;;  %v898_v10 = vld [vmem:[%s2286_s4] sm:$0xff] }
 0x23e   : > { %v843_v12 = vpop.f32.mrf.mxu1 }
 0x23f   : > { %v892_v14 = vmax.f32 %v841_v11, %v843_v12  ;;  %v899_v12 = vld [vmem:[%s2286_s4 + $0x8] sm:$0xff] }
 0x240   : > { %v845_v15 = vpop.f32.mrf.mxu1 }
 0x241   : > { %884 = vmax.xlane.f32.xlu1 %v883_v13  ;;  %893 = vmax.xlane.f32.xlu0 %v892_v14 }
 0x242   : > { %v847_v16 = vpop.f32.mrf.mxu1 }
 0x243   : > { %v895_v18 = vmax.f32 %v845_v15, %v847_v16 }
 0x245   : > { %878 = vmax.xlane.f32.xlu1 %v877_v17  ;;  %896 = vmax.xlane.f32.xlu0 %v895_v18 }
 0x249   : > { %872 = vmax.xlane.f32.xlu1 %v871_v19  ;;  %881 = vmax.xlane.f32.xlu0 %v880_v20  ;;  %v1807_v19 = vld [vmem:[%s2288_s6 + $0x8] sm:$0xff]   ;;  %v1808_v20 = vld [vmem:[%s2288_s6 + $0x10] sm:$0xff]  }
 0x24d   : > { %866 = vmax.xlane.f32.xlu1 %v865_v21  ;;  %875 = vmax.xlane.f32.xlu0 %v874_v22  ;;  %v1809_v21 = vld [vmem:[%s2288_s6 + $0x18] sm:$0xff]   ;;  %v1810_v22 = vld [vmem:[%s2288_s6 + $0x20] sm:$0xff]  }
 0x251   : > { %860 = vmax.xlane.f32.xlu1 %v859_v23  ;;  %869 = vmax.xlane.f32.xlu0 %v868_v25  ;;  %v1811_v23 = vld [vmem:[%s2288_s6 + $0x28] sm:$0xff]   ;;  %v1812_v25 = vld [vmem:[%s2288_s6 + $0x30] sm:$0xff]  }
 0x255   : > { %854 = vmax.xlane.f32.xlu1 %v853_v47  ;;  %863 = vmax.xlane.f32.xlu0 %v862_v26  ;;  %v1813_v26 = vld [vmem:[%s2288_s6 + $0x38] sm:$0xff]  }
 0x259   : > { %857 = vmax.xlane.f32.xlu0 %v856_v50  ;;  %v907_v50 = vld [vmem:[%s2286_s4 + $0x48] sm:$0xff] }
 0x25d   : > { %851 = vmax.xlane.f32.xlu0 %v850_v44 }
 0x2c2   : > { %v888_v29 = vpop.xlane.xlu1 %887 }
 0x2c3   : > { %v926_v40 = vadd.f32 %v910_v38, %v888_v29  ;;  %v955_v38 = vld [vmem:[%s2289_s7 + $0x8] sm:$0xff] }
 0x2c6   : > { %v891_v30 = vpop.xlane.xlu1 %890 }
 0x2c7   : > { %v927_v24 = vadd.f32 %v911_v33, %v891_v30  ;;  %v954_v30 = vld [vmem:[%s2289_s7] sm:$0xff]  ;;  %v957_v33 = vld [vmem:[%s2289_s7 + $0x18] sm:$0xff] }
 0x2c9   : > { %v952_v45 = vpack.c.bf16 %v927_v24, %v926_v40  ;;  %v960_v24 = vld [vmem:[%s2289_s7 + $0x30] sm:$0xff] }
 0x2ca   : > { %v885_v31 = vpop.xlane.xlu1 %884  ;;  %v894_v32 = vpop.xlane.xlu0 %893 }
 0x2cb   : > { %v928_v34 = vadd.f32 %v912_v35, %v894_v32  ;;  %v925_v49 = vadd.f32 %v909_v43, %v885_v31  ;;  %v961_v43 = vld [vmem:[%s2289_s7 + $0x38] sm:$0xff] }
 0x2ce   : > { %v879_v36 = vpop.xlane.xlu1 %878  ;;  %v897_v27 = vpop.xlane.xlu0 %896 }
 0x2cf   : > { %v929_v37 = vadd.f32 %v913_v42, %v897_v27  ;;  %v923_v54 = vadd.f32 %v907_v50, %v879_v36 }
 0x2d1   : > { %v953_v41 = vpack.c.bf16 %v929_v37, %v928_v34 }
 0x2d2   : > { %v882_v44 = vpop.xlane.xlu0 %881  ;;  %v873_v47 = vpop.xlane.xlu1 %872 }
 0x2d3   : > { %v924_v46 = vadd.f32 %v908_v39, %v882_v44  ;;  %1672 = vmatprep.subr.bf16.mxu0 %v953_v41  ;;  %v921_v61 = vadd.f32 %v905_v55, %v873_v47  ;;  %v958_v39 = vld [vmem:[%s2289_s7 + $0x20] sm:$0xff] }
 0x2d4   : > { %1673 = vmatpush3.bf16.msra.mxu0 %v953_v41 }
 0x2d5   : > { %1674 = vmatprep.subr.bf16.mxu0 %v952_v45  ;;  %v951_v52 = vpack.c.bf16 %v925_v49, %v924_v46  ;;  %v959_v46 = vld [vmem:[%s2289_s7 + $0x28] sm:$0xff]  ;;  %v964_v49 = vld [vmem:[%s2289_s7 + $0x50] sm:$0xff] }
 0x2d6   : > { %v876_v51 = vpop.xlane.xlu0 %875  ;;  %v867_v56 = vpop.xlane.xlu1 %866 }
 0x2d7   : > { %v922_v53 = vadd.f32 %v906_v48, %v876_v51  ;;  %v919_v4 = vadd.f32 %v903_v62, %v867_v56 }
 0x2d8   : > { %1675 = vmatpush3.bf16.msra.mxu0 %v952_v45 }
 0x2d9   : > { %1676 = vmatprep.subr.bf16.mxu0 %v951_v52  ;;  %v950_v58 = vpack.c.bf16 %v923_v54, %v922_v53  ;;  %v965_v54 = vld [vmem:[%s2289_s7 + $0x58] sm:$0xff] }
 0x2da   : > { %v870_v57 = vpop.xlane.xlu0 %869  ;;  %v861_v2 = vpop.xlane.xlu1 %860 }
 0x2db   : > { %v920_v59 = vadd.f32 %v904_v5, %v870_v57  ;;  %v917_v11 = vadd.f32 %v901_v6, %v861_v2  ;;  %v963_v57 = vld [vmem:[%s2289_s7 + $0x48] sm:$0xff]  ;;  %v969_v2 = vld [vmem:[%s2289_s7 + $0x78] sm:$0xff] }
 0x2dc   : > { %1677 = vmatpush3.bf16.msra.mxu0 %v951_v52  ;;  %v962_v52 = vld [vmem:[%s2289_s7 + $0x40] sm:$0xff]  ;;  %v967_v6 = vld [vmem:[%s2289_s7 + $0x68] sm:$0xff] }
 0x2dd   : > { %1678 = vmatprep.subr.bf16.mxu0 %v950_v58  ;;  %v949_v0 = vpack.c.bf16 %v921_v61, %v920_v59 }
 0x2de   : > { %v864_v63 = vpop.xlane.xlu0 %863  ;;  %v855_v13 = vpop.xlane.xlu1 %854 }
 0x2df   : > { %v918_v1 = vadd.f32 %v902_v60, %v864_v63  ;;  %v915_v17 = vadd.f32 %v899_v12, %v855_v13  ;;  %v968_v60 = vld [vmem:[%s2289_s7 + $0x70] sm:$0xff]  ;;  %v966_v63 = vld [vmem:[%s2289_s7 + $0x60] sm:$0xff] }
 0x2e0   : > { %1679 = vmatpush3.bf16.msra.mxu0 %v950_v58 }
 0x2e1   : > { %1680 = vmatprep.subr.bf16.mxu0 %v949_v0  ;;  %v948_v8 = vpack.c.bf16 %v919_v4, %v918_v1 }
 0x2e2   : > { %v858_v7 = vpop.xlane.xlu0 %857 }
 0x2e3   : > { %v916_v9 = vadd.f32 %v900_v3, %v858_v7 }
 0x2e4   : > { %1681 = vmatpush3.bf16.msra.mxu0 %v949_v0 }
 0x2e5   : > { %1682 = vmatprep.subr.bf16.mxu0 %v948_v8  ;;  %v947_v15 = vpack.c.bf16 %v917_v11, %v916_v9 }
 0x2e6   : > { %v852_v14 = vpop.xlane.xlu0 %851 }
 0x2e7   : > { %v914_v16 = vadd.f32 %v898_v10, %v852_v14 }
 0x2e8   : > { %1683 = vmatpush3.bf16.msra.mxu0 %v948_v8 }
 0x2e9   : > { %1684 = vmatprep.subr.bf16.mxu0 %v947_v15  ;;  %v946_v18 = vpack.c.bf16 %v915_v17, %v914_v16 }
 0x2ec   : > { %1685 = vmatpush3.bf16.msra.mxu0 %v947_v15 }
 0x2ed   : > { %1686 = vmatprep.subr.bf16.mxu0 %v946_v18 }
 0x2f0   : > { %1687 = vmatpush3.bf16.msra.mxu0 %v946_v18 }
 0x2f3   : > { %1689 = vmatmul.mubr.bf16.vlgmr.msra.gmra.mxu0 %v1807_v19 }
 0x2f4   : > { %1692 = vmatprep.mubr.bf16.mxu0 %v1808_v20 }
 0x2fb   : > { %1693 = vmatmul.mubr.bf16.gmra.mxu0 %v1809_v21 }
 0x2fc   : > { %1696 = vmatprep.mubr.bf16.mxu0 %v1810_v22 }
 0x303   : > { %1697 = vmatmul.mubr.bf16.gmra.mxu0 %v1811_v23 }
 0x304   : > { %1700 = vmatprep.mubr.bf16.mxu0 %v1812_v25 }
 0x30b   : > { %1701 = vmatmul.mubr.bf16.gmra.mxu0 %v1813_v26 }
 0x3b3   : > { %v1690_v29 = vpop.f32.mrf.mxu0 }
 0x3b4   : > { %v1061_v31 = vadd.f32 %v1690_v29, %v956_v28 }
 0x3b5   : > { %v1052_v32 = vpop.f32.mrf.mxu0 }
 0x3b6   : > { %1118 = vst.msk [vmem:[#allocation2 + $0x10] sm:$0xff] %vm1115_vm3, %v1061_v31  ;;  %v1053_v35 = vadd.f32 %v1052_v32, %v954_v30 }
 0x3b7   : > { %v1691_v42 = vpop.f32.mrf.mxu0 }
 0x3b8   : > { %1116 = vst.msk [vmem:[#allocation2] sm:$0xff] %vm1115_vm3, %v1053_v35  ;;  %v1064_v36 = vadd.f32 %v1691_v42, %v957_v33 }
 0x3b9   : > { %v1055_v27 = vpop.f32.mrf.mxu0 }
 0x3ba   : > { %1119 = vst.msk [vmem:[#allocation2 + $0x18] sm:$0xff] %vm1115_vm3, %v1064_v36  ;;  %v1056_v34 = vadd.f32 %v1055_v27, %v955_v38 }
 0x3bb   : > { %v1694_v37 = vpop.f32.mrf.mxu0 }
 0x3bc   : > { %1117 = vst.msk [vmem:[#allocation2 + $0x8] sm:$0xff] %vm1115_vm3, %v1056_v34  ;;  %v1077_v40 = vadd.f32 %v1694_v37, %v960_v24 }
 0x3bd   : > { %v1068_v41 = vpop.f32.mrf.mxu0 }
 0x3be   : > { %1122 = vst.msk [vmem:[#allocation2 + $0x30] sm:$0xff] %vm1115_vm3, %v1077_v40  ;;  %v1069_v44 = vadd.f32 %v1068_v41, %v958_v39 }
 0x3bf   : > { %v1695_v45 = vpop.f32.mrf.mxu0 }
 0x3c0   : > { %1120 = vst.msk [vmem:[#allocation2 + $0x20] sm:$0xff] %vm1115_vm3, %v1069_v44  ;;  %v1080_v47 = vadd.f32 %v1695_v45, %v961_v43 }
 0x3c1   : > { %v1071_v48 = vpop.f32.mrf.mxu0 }
 0x3c2   : > { %1123 = vst.msk [vmem:[#allocation2 + $0x38] sm:$0xff] %vm1115_vm3, %v1080_v47  ;;  %v1072_v50 = vadd.f32 %v1071_v48, %v959_v46 }
 0x3c3   : > { %v1698_v51 = vpop.f32.mrf.mxu0 }
 0x3c4   : > { %1121 = vst.msk [vmem:[#allocation2 + $0x28] sm:$0xff] %vm1115_vm3, %v1072_v50  ;;  %v1093_v53 = vadd.f32 %v1698_v51, %v964_v49 }
 0x3c5   : > { %v1084_v5 = vpop.f32.mrf.mxu0 }
 0x3c6   : > { %1126 = vst.msk [vmem:[#allocation2 + $0x50] sm:$0xff] %vm1115_vm3, %v1093_v53  ;;  %v1085_v55 = vadd.f32 %v1084_v5, %v962_v52 }
 0x3c7   : > { %v1699_v56 = vpop.f32.mrf.mxu0 }
 0x3c8   : > { %1124 = vst.msk [vmem:[#allocation2 + $0x40] sm:$0xff] %vm1115_vm3, %v1085_v55  ;;  %v1096_v58 = vadd.f32 %v1699_v56, %v965_v54 }
 0x3c9   : > { %v1087_v59 = vpop.f32.mrf.mxu0 }
 0x3ca   : > { %1127 = vst.msk [vmem:[#allocation2 + $0x58] sm:$0xff] %vm1115_vm3, %v1096_v58  ;;  %v1088_v61 = vadd.f32 %v1087_v59, %v963_v57 }
 0x3cb   : > { %v1702_v62 = vpop.f32.mrf.mxu0 }
 0x3cc   : > { %1125 = vst.msk [vmem:[#allocation2 + $0x48] sm:$0xff] %vm1115_vm3, %v1088_v61  ;;  %v1109_v0 = vadd.f32 %v1702_v62, %v968_v60 }
 0x3cd   : > { %v1100_v1 = vpop.f32.mrf.mxu0 }
 0x3ce   : > { %1130 = vst.msk [vmem:[#allocation2 + $0x70] sm:$0xff] %vm1115_vm3, %v1109_v0  ;;  %v1101_v3 = vadd.f32 %v1100_v1, %v966_v63 }
 0x3cf   : > { %v1703_v4 = vpop.f32.mrf.mxu0 }
 0x3d0   : > { %1128 = vst.msk [vmem:[#allocation2 + $0x60] sm:$0xff] %vm1115_vm3, %v1101_v3  ;;  %v1112_v7 = vadd.f32 %v1703_v4, %v969_v2 }
 0x3d1   : > { %v1103_v8 = vpop.f32.mrf.mxu0 }
 0x3d2   : > { %1131 = vst.msk [vmem:[#allocation2 + $0x78] sm:$0xff] %vm1115_vm3, %v1112_v7  ;;  %v1104_v9 = vadd.f32 %v1103_v8, %v967_v6 }
 0x3d4   : > { %1129 = vst.msk [vmem:[#allocation2 + $0x68] sm:$0xff] %vm1115_vm3, %v1104_v9 }
 0x3d5 PF: > { %v1148_v10 = vld [vmem:[%s1971_s14] sm:$0x3]  ;;  %vm1310_vm4 = vcmask 1040384   ;;  %vm1311_vm5 = vcmask 1041408   ;;  %v1866_v12 = vmov 65535   ;;  %vm1285_vm6 = vcmask 23552  }
 0x3d6   : > { %v1816_v11 = vld [vmem:[%s2287_s5] sm:$0xff]   ;;  %v1312_v13 = vsel %vm1310_vm4, 4294967295, %v1866_v12  ;;  %v1867_v16 = vmov 0   ;;  %v1817_v17 = vld [vmem:[%s2287_s5 + $0x8] sm:$0xff]   ;;  %v1818_v18 = vld [vmem:[%s2287_s5 + $0x10] sm:$0xff]   ;;  %v1868_v39 = vmov 0.0  }
 0x3d7   : > { %v1313_v14 = vsel %vm1311_vm5, %v1312_v13, 0  ;;  %1706 = vmatprep.mubr.msk.bf16.mxu0 %vm1285_vm6, %v1816_v11  ;;  %1814 = vset.pattern.permute.xlu0 %v1867_v16  ;;  %v1163_v19 = vld [vmem:[#allocation2 + $0x70] sm:$0xff]  ;;  %v1161_v20 = vld [vmem:[#allocation2 + $0x60] sm:$0xff]  ;;  %v1819_v23 = vld [vmem:[%s2287_s5 + $0x18] sm:$0xff]   ;;  %vm1869_vm7 = vmmov 0   ;;  %s1439_s14 = sld [smem:[#allocation3]] }
 0x3d8   : > { %v1315_v15 = vand.u32 %v1313_v14, %v1148_v10  ;;  %1815 = vset.pattern.permute.xlu1 %v1867_v16  ;;  %1237 = vperm.xlu0 %1814, %v1163_v19   ;;  %v1820_v25 = vld [vmem:[%s2287_s5 + $0x20] sm:$0xff]   ;;  %v1159_v26 = vld [vmem:[#allocation2 + $0x50] sm:$0xff]  ;;  %v1160_v28 = vld [vmem:[#allocation2 + $0x58] sm:$0xff] }
 0x3d9   : > { %v1164_v21 = vld [vmem:[#allocation2 + $0x78] sm:$0xff]  ;;  %1227 = vperm.xlu1 %1815, %v1161_v20   ;;  %v1157_v29 = vld [vmem:[#allocation2 + $0x40] sm:$0xff]  ;;  %v1158_v30 = vld [vmem:[#allocation2 + $0x48] sm:$0xff]  ;;  %1722 = vmatprep.subr.bf16.mxu1 %v1868_v39 }
 0x3da   : > { %1704 = vmatprep.subr.bf16.mxu0 %v1315_v15  ;;  %v1821_v31 = vld [vmem:[%s2287_s5 + $0x28] sm:$0xff]   ;;  %v1822_v32 = vld [vmem:[%s2287_s5 + $0x30] sm:$0xff]   ;;  %v1156_v35 = vld [vmem:[#allocation2 + $0x38] sm:$0xff]  ;;  %1738 = vmatprep.mubr.msk.bf16.mxu1 %vm1869_vm7, %v1868_v39 }
 0x3db   : > { %1705 = vmatpush3.bf16.msra.mxu0 %v1315_v15  ;;  %v1162_v22 = vld [vmem:[#allocation2 + $0x68] sm:$0xff]  ;;  %v1155_v33 = vld [vmem:[#allocation2 + $0x30] sm:$0xff]  ;;  %v1153_v42 = vld [vmem:[#allocation2 + $0x20] sm:$0xff] }
 0x3dc   : > { %1242 = vperm.xlu0 %1814, %v1164_v21   ;;  %v1154_v38 = vld [vmem:[#allocation2 + $0x28] sm:$0xff]  ;;  %v1823_v36 = vld [vmem:[%s2287_s5 + $0x38] sm:$0xff]   ;;  %v1151_v27 = vld [vmem:[#allocation2 + $0x10] sm:$0xff] }
 0x3dd   : > { %1232 = vperm.xlu1 %1815, %v1162_v22   ;;  %v1152_v24 = vld [vmem:[#allocation2 + $0x18] sm:$0xff]  ;;  %v1149_v34 = vld [vmem:[#allocation2] sm:$0xff]  ;;  %v1150_v37 = vld [vmem:[#allocation2 + $0x8] sm:$0xff] }
 0x3de   : > { %1707 = vmatmul.mubr.msk.bf16.vlgmr.msra.gmra.mxu0 %vm1285_vm6, %v1817_v17 }
 0x3df   : > { %1710 = vmatprep.mubr.msk.bf16.mxu0 %vm1285_vm6, %v1818_v18 }
 0x3e0   : > { %1217 = vperm.xlu0 %1814, %v1159_v26  }
 0x3e1   : > { %1222 = vperm.xlu1 %1815, %v1160_v28  }
 0x3e4   : > { %1207 = vperm.xlu0 %1814, %v1157_v29  }
 0x3e5   : > { %1212 = vperm.xlu1 %1815, %v1158_v30  }
 0x3e6   : > { %1711 = vmatmul.mubr.msk.bf16.gmra.mxu0 %vm1285_vm6, %v1819_v23 }
 0x3e7   : > { %1714 = vmatprep.mubr.msk.bf16.mxu0 %vm1285_vm6, %v1820_v25 }
 0x3e8   : > { %1197 = vperm.xlu0 %1814, %v1155_v33  }
 0x3e9   : > { %1202 = vperm.xlu1 %1815, %v1156_v35  }
 0x3ec   : > { %1187 = vperm.xlu0 %1814, %v1153_v42  }
 0x3ed   : > { %1192 = vperm.xlu1 %1815, %v1154_v38  }
 0x3ee   : > { %1715 = vmatmul.mubr.msk.bf16.gmra.mxu0 %vm1285_vm6, %v1821_v31 }
 0x3ef   : > { %1718 = vmatprep.mubr.msk.bf16.mxu0 %vm1285_vm6, %v1822_v32 }
 0x3f0   : > { %1177 = vperm.xlu0 %1814, %v1151_v27  }
 0x3f1   : > { %1182 = vperm.xlu1 %1815, %v1152_v24  }
 0x3f4   : > { %1167 = vperm.xlu0 %1814, %v1149_v34  }
 0x3f5   : > { %1172 = vperm.xlu1 %1815, %v1150_v37  }
 0x3f6   : > { %1719 = vmatmul.mubr.msk.bf16.gmra.mxu0 %vm1285_vm6, %v1823_v36 }
 0x453   : > { %v1238_v47 = vpop.permute.xlu0 %1237 }
 0x454   : > { %v1228_v45 = vpop.permute.xlu1 %1227 }
 0x457   : > { %v1243_v52 = vpop.permute.xlu0 %1242 }
 0x458   : > { %v1233_v50 = vpop.permute.xlu1 %1232 }
 0x45b   : > { %v1218_v56 = vpop.permute.xlu0 %1217 }
 0x45c   : > { %v1223_v54 = vpop.permute.xlu1 %1222 }
 0x45f   : > { %v1208_v62 = vpop.permute.xlu0 %1207 }
 0x460   : > { %v1213_v59 = vpop.permute.xlu1 %1212 }
 0x463   : > { %v1198_v11 = vpop.permute.xlu0 %1197 }
 0x464   : > { %v1203_v7 = vpop.permute.xlu1 %1202 }
 0x467   : > { %v1188_v20 = vpop.permute.xlu0 %1187 }
 0x468   : > { %v1193_v17 = vpop.permute.xlu1 %1192 }
 0x46b   : > { %v1178_v32 = vpop.permute.xlu0 %1177 }
 0x46c   : > { %v1183_v28 = vpop.permute.xlu1 %1182 }
 0x46f   : > { %v1168_v37 = vpop.permute.xlu0 %1167 }
 0x470   : > { %v1173_v27 = vpop.permute.xlu1 %1172 }
 0x49e   : > { %v2243_v40 = vpop.f32.mrf.mxu0 }
 0x49f   : > { %v1360_v24 = vadd.f32 %v2243_v40, %v1178_v32 }
 0x4a0   : > { %v2245_v41 = vpop.f32.mrf.mxu0 }
 0x4a2   : > { %v1709_v43 = vpop.f32.mrf.mxu0 }
 0x4a3   : > { %v1363_v42 = vadd.f32 %v1709_v43, %v1183_v28 }
 0x4a4   : > { %v2247_v44 = vpop.f32.mrf.mxu0 }
 0x4a6   : > { %v1712_v46 = vpop.f32.mrf.mxu0 }
 0x4a7   : > { %v1376_v25 = vadd.f32 %v1712_v46, %v1198_v11  ;;  %v1355_v46 = vadd.f32 %v2247_v44, %v1173_v27  ;;  %v1430_v44 = vld [vmem:[%s2290_s8] sm:$0x1] }
 0x4a8   : > { %v1367_v48 = vpop.f32.mrf.mxu0 }
 0x4a9   : > { %v1420_v33 = vmax.f32 %v1376_v25, 0.0  ;;  %v1368_v35 = vadd.f32 %v1367_v48, %v1188_v20  ;;  %v1352_v48 = vadd.f32 %v2245_v41, %v1168_v37 }
 0x4aa   : > { %v1713_v49 = vpop.f32.mrf.mxu0 }
 0x4ab   : > { %v1379_v21 = vadd.f32 %v1713_v49, %v1203_v7  ;;  %v1418_v34 = vmax.f32 %v1368_v35, 0.0  ;;  %v1416_v49 = vmax.f32 %v1360_v24, 0.0 }
 0x4ac   : > { %v1370_v51 = vpop.f32.mrf.mxu0 }
 0x4ad   : > { %v1421_v29 = vmax.f32 %v1379_v21, 0.0  ;;  %v1371_v30 = vadd.f32 %v1370_v51, %v1193_v17  ;;  %v1414_v51 = vmax.f32 %v1352_v48, 0.0 }
 0x4ae   : > { %v1716_v53 = vpop.f32.mrf.mxu0 }
 0x4af   : > { %v1392_v12 = vadd.f32 %v1716_v53, %v1218_v56  ;;  %v1434_v38 = vpack.c.bf16 %v1421_v29, %v1420_v33  ;;  %v1419_v36 = vmax.f32 %v1371_v30, 0.0 }
 0x4b0   : > { %v1383_v5 = vpop.f32.mrf.mxu0 }
 0x4b1   : > { %v1424_v18 = vmax.f32 %v1392_v12, 0.0  ;;  %v1384_v19 = vadd.f32 %v1383_v5, %v1208_v62 }
 0x4b2   : > { %v1717_v55 = vpop.f32.mrf.mxu0 }
 0x4b3   : > { %v1395_v8 = vadd.f32 %v1717_v55, %v1223_v54  ;;  %v1422_v26 = vmax.f32 %v1384_v19, 0.0 }
 0x4b4   : > { %v1386_v57 = vpop.f32.mrf.mxu0 }
 0x4b5   : > { %v1425_v14 = vmax.f32 %v1395_v8, 0.0  ;;  %v1387_v15 = vadd.f32 %v1386_v57, %v1213_v59 }
 0x4b6   : > { %v1720_v58 = vpop.f32.mrf.mxu0 }
 0x4b7   : > { %v1408_v61 = vadd.f32 %v1720_v58, %v1238_v47  ;;  %v1436_v22 = vpack.c.bf16 %v1425_v14, %v1424_v18  ;;  %v1423_v23 = vmax.f32 %v1387_v15, 0.0  ;;  %v1433_v47 = vpack.c.bf16 %v1419_v36, %v1418_v34 }
 0x4b8   : > { %v1399_v60 = vpop.f32.mrf.mxu0 }
 0x4b9   : > { %v1428_v2 = vmax.f32 %v1408_v61, 0.0  ;;  %v1400_v3 = vadd.f32 %v1399_v60, %v1228_v45  ;;  %v1435_v31 = vpack.c.bf16 %v1423_v23, %v1422_v26  ;;  %v1417_v45 = vmax.f32 %v1363_v42, 0.0 }
 0x4ba   : > { %v1721_v63 = vpop.f32.mrf.mxu0 }
 0x4bb   : > { %v1411_v0 = vadd.f32 %v1721_v63, %v1243_v52  ;;  %v1426_v13 = vmax.f32 %v1400_v3, 0.0  ;;  %v1432_v43 = vpack.c.bf16 %v1417_v45, %v1416_v49  ;;  %v1440_v52 = vstv %s1439_s14 }
 0x4bc   : > { %v1402_v1 = vpop.f32.mrf.mxu0 }
 0x4bd   : > { %v1429_v4 = vmax.f32 %v1411_v0, 0.0  ;;  %v1403_v6 = vadd.f32 %v1402_v1, %v1233_v50  ;;  %v1415_v50 = vmax.f32 %v1355_v46, 0.0 }
 0x4bf   : > { %v1427_v9 = vmax.f32 %v1403_v6, 0.0  ;;  %v1438_v10 = vpack.c.bf16 %v1429_v4, %v1428_v2  ;;  %v1431_v40 = vpack.c.bf16 %v1415_v50, %v1414_v51 }
 0x4c1   : > { %1723 = vmatpush3.bf16.msra.mxu1 %v1438_v10  ;;  %v1437_v16 = vpack.c.bf16 %v1427_v9, %v1426_v13 }
 0x4c2   : > { %1724 = vmatprep.subr.bf16.mxu1 %v1868_v39 }
 0x4c5   : > { %1725 = vmatpush3.bf16.msra.mxu1 %v1437_v16 }
 0x4c6   : > { %1726 = vmatprep.subr.bf16.mxu1 %v1868_v39 }
 0x4c9   : > { %1727 = vmatpush3.bf16.msra.mxu1 %v1436_v22 }
 0x4ca   : > { %1728 = vmatprep.subr.bf16.mxu1 %v1868_v39 }
 0x4cd   : > { %1729 = vmatpush3.bf16.msra.mxu1 %v1435_v31 }
 0x4ce   : > { %1730 = vmatprep.subr.bf16.mxu1 %v1868_v39 }
 0x4d1   : > { %1731 = vmatpush3.bf16.msra.mxu1 %v1434_v38 }
 0x4d2   : > { %1732 = vmatprep.subr.bf16.mxu1 %v1868_v39 }
 0x4d5   : > { %1733 = vmatpush3.bf16.msra.mxu1 %v1433_v47 }
 0x4d6   : > { %1734 = vmatprep.subr.bf16.mxu1 %v1868_v39 }
 0x4d9   : > { %1735 = vmatpush3.bf16.msra.mxu1 %v1432_v43 }
 0x4da   : > { %1736 = vmatprep.subr.bf16.mxu1 %v1868_v39 }
 0x4dd   : > { %1737 = vmatpush3.bf16.msra.mxu1 %v1431_v40 }
 0x4e0   : > { %1739 = vmatmul.mubr.bf16.vlgmr.msra.gmra.mxu1 %v1430_v44 }
 0x5a0   : > { %v1475_v41 = vpop.f32.mrf.mxu1 }
 0x5a1   : > { %v1476_v53 = vadd.f32 %v1475_v41, %v1440_v52 }
 0x5a2   : > { %v1740_v5 = vpop.f32.mrf.mxu1 }
 0x5a3   : > { %1481 = vst [vmem:[%s409_s11] sm:$0x1] %v1476_v53 }
 0x5a4   : > { %v1478_v54 = vpop.f32.mrf.mxu1 }
 0x5a6   : > { %v1741_v55 = vpop.f32.mrf.mxu1 }
 0x5a7 PF: > { %s21_s19 = sadd.s32 1, %s1862_s19   ;;  %s2293_s15 = smov %s1854_s17 }
 0x5a8   : > { %p18_p8 = scmp.ge.s32.totalorder %s21_s19, 6   ;;  %s2294_s16 = smov %s1858_s18 }
 0x5a9   : > { %s2295_s17 = smov %s2298_s9  ;;  %s2296_s18 = smov %s2302_s20 }
 0x5aa   :  { %20 = sbr.rel (!%p18_p8) target bundleno = 3 (0x3), region = 97 }

</bundles_post_ra>
